<compile_context>
chip_gen: v5e
topology: v5e:2x2
jax: 0.10.0
libtpu: 0.0.40
codegen_flags: <defaults>
</compile_context>

<pallas_src>
import functools
import math

import jax
import jax.numpy as jnp
from jax.experimental import pallas as pl
from jax.experimental.pallas import tpu as pltpu


def _sublane_multiple(dtype) -> int:
    # f32 -> 8, bf16 -> 16, int8/fp8 -> 32
    return {4: 8, 2: 16, 1: 32}.get(jnp.dtype(dtype).itemsize, 8)


def _rmsnorm_kernel(x_ref, w_ref, o_ref, *, eps, inv_dim):
    # x_ref: (rows_tile, dim), w_ref: (1, dim), o_ref: (rows_tile, dim)
    x_in = x_ref[...]
    x = x_in.astype(jnp.float32)                                 # x.float()
    ms = jnp.sum(x * x, axis=-1, keepdims=True) * inv_dim        # mean(x^2, -1)
    normed = x * jax.lax.rsqrt(ms + eps)                         # x * rsqrt(ms + eps)
    if x_in.dtype != jnp.float32:
        normed = normed.astype(x_in.dtype)                       # .type_as(x)
    o_ref[...] = (w_ref[...] * normed).astype(o_ref.dtype)       # weight * normed


def rmsnorm(x, weight, eps=1e-6, rows_per_block=None):
    """Pallas RMSNorm over the last axis of `x`.

    x: (..., dim)   weight: (dim,)
    Matches PyTorch: weight * (x.float() * rsqrt(mean(x^2, -1) + eps)).type_as(x)
    """
    orig_shape = x.shape
    dim = int(orig_shape[-1])
    rows = int(math.prod(orig_shape[:-1])) if len(orig_shape) > 1 else 1
    x2d = x.reshape(rows, dim)
    w2d = weight.reshape(1, dim)

    # Output dtype follows PyTorch promotion: weight (f32) * normed (x.dtype)
    out_dtype = jnp.promote_types(weight.dtype, x.dtype)

    # ---------------- generation-aware VMEM sizing --------------------------
    try:
        vmem_cap = int(pltpu.get_tpu_info().vmem_capacity_bytes)
    except Exception:
        vmem_cap = 64 * 1024 * 1024          # assume the smallest (v7x-like) VMEM
    if vmem_cap >= 128 * 1024 * 1024:        # v5e / v6e: 128 MiB of VMEM available
        vmem_budget = 48 * 1024 * 1024
        vmem_limit = 100 * 1024 * 1024
    else:                                     # v7x: 64 MiB physical, 32 MiB scoped
        vmem_budget = 16 * 1024 * 1024
        vmem_limit = 32 * 1024 * 1024

    in_bytes = jnp.dtype(x.dtype).itemsize
    out_bytes = jnp.dtype(out_dtype).itemsize
    w_bytes = jnp.dtype(weight.dtype).itemsize
    # In-kernel f32 working copy (x.astype(f32) / x*x) for non-f32 inputs.
    work_bytes = 0 if jnp.dtype(x.dtype) == jnp.float32 else 4
    # Per-row VMEM cost: double-buffered in + out blocks, plus the f32 intermediate.
    bytes_per_row = dim * (2 * (in_bytes + out_bytes) + work_bytes)

    # ---------------- row-tile sizing ---------------------------------------
    sub = _sublane_multiple(x.dtype)
    if rows_per_block is None:
        rows_per_block = 1024                 # large streaming tile (amortize ~0.35us/step)
    rows_per_block = min(rows_per_block, rows)
    rows_per_block = max(sub, ((rows_per_block + sub - 1) // sub) * sub)

    max_rows = max(sub, (vmem_budget // max(bytes_per_row, 1)) // sub * sub)
    rows_per_block = min(rows_per_block, max_rows)

    # v7x megacore occupancy: give the "parallel" row axis at least 2 tiles so
    # both TensorCores get work (no-op cost on 1-TC v5e/v6e).
    if rows >= 2 * sub and pl.cdiv(rows, rows_per_block) < 2:
        half = pl.cdiv(rows, 2)
        rows_per_block = max(sub, ((half + sub - 1) // sub) * sub)

    n_steps = pl.cdiv(rows, rows_per_block)
    grid = (n_steps,)

    # Deepen input buffering when tiles are small (exposed DMA issue latency).
    n_in_bufs = 2
    x_spec_kwargs = {}
    if n_steps >= 4 and rows_per_block <= 256 and rows_per_block * dim * in_bytes <= (2 << 20):
        n_in_bufs = 3
        x_spec_kwargs["pipeline_mode"] = pl.Buffered(3)

    # Make sure the declared limit actually covers the chosen tiles (wide-row
    # degenerate case); raise it toward physical VMEM instead of silently
    # over-committing.
    needed = (rows_per_block * dim * (n_in_bufs * in_bytes + 2 * out_bytes + work_bytes)
              + 2 * dim * w_bytes)
    if needed + (2 << 20) > vmem_limit:
        vmem_limit = min(needed + (4 << 20), max(vmem_cap - (4 << 20), needed + (1 << 20)))
    # TODO(synk): if even a minimum sub-row tile exceeds physical VMEM (extremely
    # wide rows), a feature-axis split with a two-pass partial-sum scheme is needed.

    out = pl.pallas_call(
        functools.partial(_rmsnorm_kernel, eps=float(eps), inv_dim=1.0 / dim),
        out_shape=jax.ShapeDtypeStruct((rows, dim), out_dtype),
        grid_spec=pltpu.PrefetchScalarGridSpec(
            num_scalar_prefetch=0,
            grid=grid,
            in_specs=[
                pl.BlockSpec((rows_per_block, dim), lambda i: (i, 0), **x_spec_kwargs),
                pl.BlockSpec((1, dim), lambda i: (0, 0)),
            ],
            out_specs=pl.BlockSpec((rows_per_block, dim), lambda i: (i, 0)),
        ),
        compiler_params=pltpu.CompilerParams(
            dimension_semantics=("parallel",),       # row tiles split across TCs (v7x)
            vmem_limit_bytes=int(vmem_limit),
        ),
    )(x2d, w2d)

    return out.reshape(orig_shape)


if __name__ == "__main__":
    key = jax.random.PRNGKey(0)
    batch, seq, hidden = 2, 8, 32

    x = jax.random.normal(key, (batch, seq, hidden), dtype=jnp.float32)
    # nn.Parameter(torch.ones(dim)) — deterministic init
    weight = jnp.ones((hidden,), dtype=jnp.float32)
    eps = 1e-6

    out = rmsnorm(x, weight, eps=eps)
    out = jax.block_until_ready(out)

    # Pure-JAX reference (mirrors the PyTorch forward exactly)
    xf = x.astype(jnp.float32)
    ref = weight * (xf * jax.lax.rsqrt(jnp.mean(xf * xf, axis=-1, keepdims=True) + eps)
                    ).astype(x.dtype)
    assert out.shape == ref.shape and out.dtype == ref.dtype
    assert jnp.allclose(out, ref, atol=1e-5, rtol=1e-5)

    print("KERNEL_OK")
</pallas_src>

<mosaic_0001>
module attributes {stable_mosaic.version = 11 : i64} {
  func.func @_rmsnorm_kernel(%arg0: i32, %arg1: memref<8x32xf32, #tpu.memory_space<vmem>>, %arg2: memref<1x32xf32, #tpu.memory_space<vmem>>, %arg3: memref<8x32xf32, #tpu.memory_space<vmem>>) attributes {dimension_semantics = [#tpu.dimension_semantics<parallel>], iteration_bounds = array<i64: 2>, scalar_prefetch = 0 : i64, scratch_operands = 0 : i64, tpu.core_type = #tpu.core_type<tc>, window_params = [{transform_indices = @transform_0, window_bounds = array<i64: 8, 32>}, {pipeline_mode = #tpu.pipeline_mode<synchronous>, transform_indices = @transform_1, window_bounds = array<i64: 1, 32>}, {transform_indices = @transform_2, window_bounds = array<i64: 8, 32>}]} {
    %c0 = arith.constant 0 : index
    %c0_0 = arith.constant 0 : index
    %0 = vector.load %arg1[%c0, %c0_0] : memref<8x32xf32, #tpu.memory_space<vmem>>, vector<8x32xf32>
    %1 = arith.mulf %0, %0 : vector<8x32xf32>
    %cst = arith.constant dense<0.000000e+00> : vector<8xf32>
    %2 = vector.multi_reduction <add>, %1, %cst [1] : vector<8x32xf32> to vector<8xf32>
    %3 = vector.shape_cast %2 : vector<8xf32> to vector<8x1xf32>
    %cst_1 = arith.constant 3.125000e-02 : f32
    %4 = vector.broadcast %cst_1 : f32 to vector<8x1xf32>
    %5 = arith.mulf %3, %4 : vector<8x1xf32>
    %cst_2 = arith.constant 9.99999997E-7 : f32
    %6 = vector.broadcast %cst_2 : f32 to vector<8x1xf32>
    %7 = arith.addf %5, %6 : vector<8x1xf32>
    %8 = math.rsqrt %7 : vector<8x1xf32>
    %9 = vector.broadcast %8 : vector<8x1xf32> to vector<8x32xf32>
    %10 = arith.mulf %0, %9 : vector<8x32xf32>
    %c0_3 = arith.constant 0 : index
    %c0_4 = arith.constant 0 : index
    %11 = vector.load %arg2[%c0_3, %c0_4] : memref<1x32xf32, #tpu.memory_space<vmem>>, vector<1x32xf32>
    %12 = vector.broadcast %11 : vector<1x32xf32> to vector<8x32xf32>
    %13 = arith.mulf %12, %10 : vector<8x32xf32>
    %c0_5 = arith.constant 0 : index
    %c0_6 = arith.constant 0 : index
    %14 = vector.load %arg3[%c0_5, %c0_6] : memref<8x32xf32, #tpu.memory_space<vmem>>, vector<8x32xf32>
    tpu.vector_store %arg3[%c0_5, %c0_6], %13 {strides = array<i32>} : memref<8x32xf32, #tpu.memory_space<vmem>>, vector<8x32xf32>,
    return
  }
  func.func @transform_0(%arg0: i32) -> (i32, i32) {
    %c0_i32 = arith.constant 0 : i32
    %c0_i32_0 = arith.constant 0 : i32
    return %arg0, %c0_i32 : i32, i32
  }
  func.func @transform_1(%arg0: i32) -> (i32, i32) {
    %c0_i32 = arith.constant 0 : i32
    %c0_i32_0 = arith.constant 0 : i32
    %c0_i32_1 = arith.constant 0 : i32
    return %c0_i32, %c0_i32_0 : i32, i32
  }
  func.func @transform_2(%arg0: i32) -> (i32, i32) {
    %c0_i32 = arith.constant 0 : i32
    %c0_i32_0 = arith.constant 0 : i32
    return %arg0, %c0_i32 : i32, i32
  }
}

</mosaic_0001>

<bundles_post_ra>
// kernel: tpu_custom_call.1
= control target key start
LH: loop header
LB: loop body
LE: loop exit
PB: predicated region body
PF: predicated region fallthrough
CT: control target
= control target key end

     0   :  { %7 = vsyncpa [#allocation3], 0  ;;  %s659_s0 = inlined_call_operand.hbm [shape: f32[16,32], index: 0, kind: input, shape index: {}]   ;;  %s660_s1 = inlined_call_operand.hbm [shape: f32[1,32], index: 1, kind: input, shape index: {}]   ;;  %s661_s2 = inlined_call_operand.hbm [shape: f32[16,32], index: 2, kind: output, shape index: {}]  }
   0x1   :  { %9 = vsyncpa [#allocation3 + $0x1], 0 }
   0x2   :  { %10 = vsyncpa [#allocation6], 0 }
   0x3   :  { %11 = vsyncpa [#allocation4], 0 }
   0x4   :  { %13 = vsyncpa [#allocation4 + $0x1], 0  ;;  %s519_s9 = smov 0   ;;  %s521_s10 = smov 0  }
   0x5   :  { %s523_s11 = smov 0   ;;  %s525_s12 = smov 0  }
   0x6 LB: > { %s540_s13 = sadd.s32 4294967295, %s501_s12   ;;  %s297_s14 = sadd.s32 4294967294, %s501_s12   ;;  %s501_s12 = sphi %s525_s12, %s671_s12   ;;  %s497_s11 = sphi %s523_s11, %s670_s11   ;;  %s493_s10 = sphi %s521_s10, %s669_s10   ;;  %s489_s9 = sphi %s519_s9, %s668_s9  }
   0x7   : > { %p39_p0 = scmp.ne.s32.totalorder %s493_s10, %s489_s9  ;;  %p40_p1 = scmp.eq.s32.totalorder %s540_s13, 0 }
   0x8   : > { %p84_p2 = scmp.eq.s32.totalorder %s540_s13, 1  ;;  %p90_p3 = scmp.eq.s32.totalorder %s297_s14, 1 }
   0x9   : > { %p549_p4 = por %p40_p1, %p39_p0  ;;  %p298_p5 = scmp.ge.s32.totalorder %s501_s12, 1 }
   0xa   : > { %p554_p6 = por %p90_p3, %p39_p0  ;;  %p97_p7 = scmp.lt.s32.totalorder %s501_s12, 3 }
   0xb   : > { %s109_s19 = sshll.u32 %s660_s1, 4  ;;  %s503_s21 = smov [#allocation5]   ;;  %s110_s19 = int_to_ptr.hbm [resolvable:$true] %s109_s19 }
   0xc   : > { %p562_p8 = pnand %p298_p5, %p97_p7  ;;  %s111_s22 = sshll.u32 %s503_s21, 4  ;;  %s112_s22 = int_to_ptr.vmem [resolvable:$true] %s111_s22 }
   0xd   : > { %s572_s23 = sadd.s32 1, %s501_s12   ;;  %s26_s24 = sadd.s32 1, %s497_s11 }
   0xe   : > { %p319_p10 = pneg %p562_p8  ;;  %s23_s25 = ssub.s32 %s501_s12, %s572_s23 }
   0xf   : > { %p24_p12 = scmp.eq.s32.totalorder %s23_s25, 0  ;;  %p33_p13 = scmp.ne.s32.totalorder %s497_s11, %s493_s10 }
  0x10   : > { %p320_p11 = pnand %p319_p10, %p40_p1  ;;  %p34_p0 = scmp.eq.s32.totalorder %s501_s12, 0 }
  0x11   : > { %s581_s26 = scalar_select %p24_p12, %s497_s11, %s26_s24  }
  0x12   : > { %322 = dma.hbm_to_vmem [thread:$0]  (!%p320_p11), %s110_s19, 16, %s112_s22, [#allocation6]  }
  0x13   : > { %p585_p3 = por %p84_p2, %p33_p13  ;;  %p332_p5 = scmp.lt.s32.totalorder %s501_s12, 2 }
  0x14   : > { %s122_s28 = sand.u32 1, %s497_s11   ;;  %s302_s29 = sshll.u32 %s501_s12, 3 }
  0x15   : > { %p35_p7 = por %p34_p0, %p33_p13  ;;  %s301_s30 = sshll.u32 %s122_s28, 3 }
  0x16   : > { %s130_s5 = scalar_lea.hbm %s659_s0, %s302_s29  ;;  %s126_s7 = scalar_lea.vmem [#allocation2], %s301_s30 }
  0x17   : > { %s132_s6 = sshll.u32 %s130_s5, 4  ;;  %s134_s8 = sshll.u32 %s126_s7, 4  ;;  %s133_s6 = int_to_ptr.hbm [resolvable:$true] %s132_s6  ;;  %s135_s8 = int_to_ptr.vmem [resolvable:$true] %s134_s8 }
  0x18   : > { %p595_p10 = pnand %p332_p5, %p35_p7  ;;  %s123_s17 = scalar_lea.sflag [#allocation3], %s122_s28 }
  0x19   : > { %s401_s18 = sshra.s32 %s133_s6, 4  ;;  %s408_s24 = scalar_lea.hbm %s659_s0, 16  ;;  %s402_s18 = int_to_ptr.hbm [resolvable:$true] %s401_s18 }
  0x1a   : > { %s403_s19 = scalar_lea.hbm %s402_s18, 8  ;;  %p405_p11 = pneg %p595_p10 }
  0x1b   : > { %p404_p2 = scmp.ne.s32.totalorder %s402_s18, %s403_s19  ;;  %p409_p0 = scmp.lt.s32.totalorder %s402_s18, %s659_s0 }
  0x1c   : > { %p410_p5 = scmp.lt.s32.totalorder %s408_s24, %s403_s19 }
  0x1d   : > { %p406_p12 = pnand %p405_p11, %p404_p2 }
  0x1e   : > { %p411_p7 = por %p410_p5, %p409_p0 }
  0x1f   : > { %p407_p13 = pneg %p406_p12 }
  0x21   : > { %p412_p9 = pnand %p411_p7, %p407_p13 }
  0x23   : > { %415 = shalt.err (!%p412_p9)
}
  0x24   : > { %326 = dma.hbm_to_vmem [thread:$0]  (!%p595_p10), %s133_s6, 128, %s135_s8, %s123_s17  }
  0x25   : > { %143 = sbr.rel (%p562_p8) target bundleno = 194 (0xc2), region = 28  ;;  %s612_s28 = sand.u32 (!%p562_p8), 1, %s493_s10  }
  0x26   : > { %s304_s30 = sshll.u32 (!%p562_p8), %s612_s28, 3  ;;  %s146_s3 = scalar_lea.sflag (!%p562_p8), [#allocation3], %s612_s28 }
  0x27   : > { %s149_s4 = scalar_lea.vmem (!%p562_p8), [#allocation2], %s304_s30 }
  0x2a   : > { %476 = dma.done.wait (%p549_p4), %s146_s3, 128  }
  0x2b   : > { %478 = vsyncadd (%p549_p4), %s146_s3, 4294967168 }
  0x2c   : > { %480 = dma.done.wait (%p40_p1), [#allocation6], 16  }
  0x2d   : > { %482 = vsyncadd (%p40_p1), [#allocation6], 4294967280  ;;  %v176_v0 = vld [vmem:[%s149_s4] sm:$0xff]  ;;  %vm178_vm0 = vcmask 261120   ;;  %s308_s15 = sshll.u32 %s540_s13, 3  ;;  %s175_s7 = scalar_lea.vmem [#allocation7], %s304_s30 }
  0x2e   : > { %v177_v1 = vmul.f32 %v176_v0, %v176_v0  ;;  %s212_s6 = scalar_lea.hbm %s661_s2, %s308_s15  ;;  %v368_v12 = vld [vmem:[#allocation5] ss:$0 sm:$0xff]  ;;  %s214_s8 = sshll.u32 %s175_s7, 4  ;;  %s215_s8 = int_to_ptr.vmem [resolvable:$true] %s214_s8 }
  0x2f   : > { %s216_s14 = sshll.u32 %s212_s6, 4  ;;  %s202_s13 = scalar_lea.sflag [#allocation4], %s612_s28  ;;  %s217_s14 = int_to_ptr.hbm [resolvable:$true] %s216_s14 }
  0x30   : > { %v179_v2 = vsel %vm178_vm0, %v177_v1, 0.0  ;;  %s445_s17 = sshra.s32 %s217_s14, 4  ;;  %s451_s22 = scalar_lea.hbm %s661_s2, 16  ;;  %s446_s17 = int_to_ptr.hbm [resolvable:$true] %s445_s17 }
  0x31   : > { %180 = vadd.xlane.f32.xlu0 %v179_v2  ;;  %s447_s18 = scalar_lea.hbm %s446_s17, 8  ;;  %p452_p9 = scmp.lt.s32.totalorder %s446_s17, %s661_s2 }
  0x32   : > { %p448_p1 = scmp.ne.s32.totalorder %s446_s17, %s447_s18  ;;  %p453_p10 = scmp.lt.s32.totalorder %s451_s22, %s447_s18 }
  0x34   : > { %p449_p4 = pnand %p448_p1, %p585_p3  ;;  %p454_p2 = por %p453_p10, %p452_p9 }
  0x36   : > { %p450_p8 = pneg %p449_p4 }
  0x38   : > { %p455_p11 = pnand %p454_p2, %p450_p8 }
  0xa4   : > { %v181_v3 = vpop.xlane.xlu0 %180 }
  0xa5   : > { %v182_v4 = vmul.f32 0.03125, %v181_v3 }
  0xa7   : > { %v183_v5 = vadd.f32 1e-06, %v182_v4 }
  0xa9   : > { %369 = vrsqrt.f32 %v183_v5  ;;  %vm190_vm2 = vweird.f32 %v183_v5 }
  0xaf   : > { %v370_v6 = vpop.eup %369 }
  0xb0   : > { %v185_v7 = vmul.f32 %v370_v6, %v183_v5  ;;  %vm191_vm1 = vweird.f32 %v370_v6 }
  0xb1   : > { %vm192_vm3 = vmor %vm190_vm2, %vm191_vm1 }
  0xb2   : > { %v186_v8 = vmul.f32 %v370_v6, %v185_v7 }
  0xb4   : > { %v187_v9 = vmul.f32 0.5, %v186_v8 }
  0xb6   : > { %v188_v10 = vsub.f32 1.5, %v187_v9 }
  0xb8   : > { %v189_v11 = vmul.f32 %v370_v6, %v188_v10 }
  0xba   : > { %v193_v13 = vsel %vm192_vm3, %v370_v6, %v189_v11 }
  0xbb   : > { %v194_v14 = vmul.f32 %v193_v13, %v176_v0 }
  0xbd   : > { %v199_v15 = vmul.f32 %v368_v12, %v194_v14 }
  0xbf   : > { %200 = vst.msk [vmem:[%s175_s7] sm:$0xff] %vm178_vm0, %v199_v15 }
  0xc0   : > { %458 = shalt.err (!%p455_p11)
}
  0xc1   : > { %317 = dma.vmem_to_hbm [thread:$0]  (%p585_p3), %s215_s8, 128, %s217_s14, %s202_s13  }
  0xc2 PF: > { %s228_s29 = sand.u32 1, %s489_s9   ;;  %p667_p12 = scmp.ge.s32.totalorder %s501_s12, 2 }
  0xc3   : > { %s229_s28 = scalar_lea.sflag [#allocation4], %s228_s29 }
  0xc4   : > { %p328_p13 = pnand %p667_p12, %p554_p6 }
  0xc6   : > { %p329_p0 = pneg %p328_p13 }
  0xc8   : > { %484 = dma.done.wait (%p329_p0), %s229_s28, 128  }
  0xc9   : > { %486 = vsyncadd (%p329_p0), %s229_s28, 4294967168  ;;  %p16_p5 = scmp.ge.s32.totalorder %s572_s23, 4   ;;  %s668_s9 = smov %s493_s10 }
  0xca   : > { %s669_s10 = smov %s497_s11  ;;  %s670_s11 = smov %s581_s26 }
  0xcb   : > { %s671_s12 = smov %s572_s23  ;;  %18 = sbr.rel (!%p16_p5) target bundleno = 6 (0x6), region = 77 }
  0xd0   :  { %235 = vsyncpa [#allocation3], 1 }
  0xd1   :  { %237 = vsyncpa [#allocation3 + $0x1], 1 }
  0xd2   :  { %238 = vsyncpa [#allocation6], 1 }
  0xd3   :  { %239 = vsyncpa [#allocation4], 1 }
  0xd4   :  { %241 = vsyncpa [#allocation4 + $0x1], 1 }

</bundles_post_ra>
